<compile_context>
chip_gen: v5e
topology: v5e:2x2
jax: 0.10.0
libtpu: 0.0.40
codegen_flags: <defaults>
</compile_context>

<pallas_src>
import numpy as np
import jax
import jax.numpy as jnp
from jax.experimental import pallas as pl
from jax.experimental.pallas import tpu as pltpu

N_STATE = 32
N_HEAD = 4
DPH = N_STATE // N_HEAD
QK_SCALE = float(DPH) ** -0.5
N_MLP = 4 * N_STATE
LN_EPS = 1e-7                    # matches nn.LayerNorm(..., eps=1e-07)
_INV_SQRT2 = 0.7071067811865476

# MXU operand dtype (accumulation is always f32).  Set to jnp.float32 for bit-closer
# numerics at the cost of matmul throughput / weight VMEM.
MATMUL_DTYPE = jnp.bfloat16

_TILE_QUANTUM = 16               # keep row tiles bf16-sublane friendly (16, 128)


def _round_up(n, m):
    return (n + m - 1) // m * m


def _vmem_capacity_bytes():
    try:
        cap = int(pltpu.get_tpu_info().vmem_capacity_bytes)
        if cap > 0:
            return cap
    except Exception:
        pass
    return 64 * 1024 * 1024      # conservative default (v7x per-TC VMEM)


def _vmem_limit_bytes():
    # ~3/4 of physical VMEM: 96 MiB on v5e/v6e, 48 MiB on v7x (leaves compiler headroom).
    return (3 * _vmem_capacity_bytes()) // 4


def _default_row_tile():
    # v7x (64 MiB VMEM / TC) -> 128-row tiles; v5e/v6e (128 MiB) -> 256.
    return 128 if _vmem_capacity_bytes() <= (64 << 20) else 256


def _pinned(arr):
    """Resident (constant index_map) block; single-buffered to halve weight VMEM."""
    idx = lambda i: (0,) * arr.ndim
    try:
        return pl.BlockSpec(arr.shape, idx, pipeline_mode=pl.Buffered(1))
    except TypeError:
        return pl.BlockSpec(arr.shape, idx)


def _layer_norm(x, g, b):
    mu = jnp.mean(x, axis=-1, keepdims=True)
    var = jnp.mean((x - mu) ** 2, axis=-1, keepdims=True)
    return (x - mu) * jax.lax.rsqrt(var + LN_EPS) * g + b


# --------------------------- Pass 1: LN + fused Q|K|V projection -----------------------
def qkv_proj_kernel(x_ref, g_ref, b_ref, wqkv_ref, bqkv_ref, qkv_ref):
    xn = _layer_norm(x_ref[...], g_ref[...], b_ref[...])                     # f32
    qkv = jnp.dot(xn.astype(MATMUL_DTYPE), wqkv_ref[...],
                  preferred_element_type=jnp.float32) + bqkv_ref[...]
    qkv_ref[...] = qkv.astype(qkv_ref.dtype)


# --------------------------- Pass 2: attention + out-proj + MLP ------------------------
def _make_block_kernel(t_valid, t_pad):
    masked = t_pad > t_valid     # static: pad keys must not receive attention weight

    def block_kernel(x_ref, q3_ref, k3_ref, v3_ref,
                     wo3_ref, bo_ref, mln_g_ref, mln_b_ref,
                     w1_ref, b1_ref, w2_ref, b2_ref, o_ref):
        x = x_ref[...]                                   # (TQ, C)  f32 residual stream
        q3 = q3_ref[...]                                 # (H, TQ, DPH)   bf16
        k3 = k3_ref[...]                                 # (H, Tp, DPH)   bf16
        v3 = v3_ref[...]                                 # (H, Tp, DPH)   bf16

        # head-batched scores: batch dim h leads, contraction over DPH (no transposes).
        s = jnp.einsum('hqd,hkd->hqk', q3, k3,
                       preferred_element_type=jnp.float32)                  # (H, TQ, Tp)
        if masked:
            kpos = jax.lax.broadcasted_iota(jnp.int32, (1, 1, t_pad), 2)
            s = jnp.where(kpos < t_valid, s, -1e30)

        s = s - jnp.max(s, axis=-1, keepdims=True)
        e = jnp.exp(s)
        p = e * pl.reciprocal(jnp.sum(e, axis=-1, keepdims=True), approx=True)
        o3 = jnp.einsum('hqk,hkd->hqd', p.astype(MATMUL_DTYPE), v3,
                        preferred_element_type=jnp.float32)                 # (H, TQ, DPH)

        # fold the head concat into the out-projection (per-head accumulation on the MXU).
        attn_out = jnp.zeros(x.shape, jnp.float32)
        for h in range(N_HEAD):                                             # static unroll
            attn_out = attn_out + jnp.dot(
                o3[h].astype(MATMUL_DTYPE), wo3_ref[h],
                preferred_element_type=jnp.float32)
        x = x + attn_out + bo_ref[...]

        # MLP sub-block (elementwise math in f32; matmul operands in bf16).
        xn = _layer_norm(x, mln_g_ref[...], mln_b_ref[...])
        h1 = jnp.dot(xn.astype(MATMUL_DTYPE), w1_ref[...],
                     preferred_element_type=jnp.float32) + b1_ref[...]
        h1 = 0.5 * h1 * (1.0 + jax.lax.erf(h1 * _INV_SQRT2))                # exact GELU
        h2 = jnp.dot(h1.astype(MATMUL_DTYPE), w2_ref[...],
                     preferred_element_type=jnp.float32) + b2_ref[...]
        o_ref[...] = (x + h2).astype(o_ref.dtype)

    return block_kernel


def fuse_params(p, matmul_dtype=MATMUL_DTYPE):
    """One-time (param-load-time) fusion:
       - fold qk_scale into wk (key has no bias -> exact up to rounding order),
       - fuse Q|K|V into one (C, 3C) projection,
       - reshape wo to (H, DPH, C) so the head concat folds into the out-projection,
       - store matmul weights in bf16 (MXU operands); biases/LN params stay f32."""
    wqkv = jnp.concatenate([p["wq"], p["wk"] * QK_SCALE, p["wv"]], axis=1)
    bqkv = jnp.concatenate([p["bq"], jnp.zeros_like(p["bq"]), p["bv"]], axis=1)
    return {
        "aln_g": p["attn_ln_g"], "aln_b": p["attn_ln_b"],
        "wqkv": wqkv.astype(matmul_dtype), "bqkv": bqkv,
        "wo3": p["wo"].reshape(N_HEAD, DPH, N_STATE).astype(matmul_dtype),
        "bo": p["bo"],
        "mln_g": p["mlp_ln_g"], "mln_b": p["mlp_ln_b"],
        "w1": p["w1"].astype(matmul_dtype), "b1": p["b1"],
        "w2": p["w2"].astype(matmul_dtype), "b2": p["b2"],
    }


def residual_attention_block(x, fp, *, row_tile=None):
    """x: (1, T, C) float32, fp: fused params -> (1, T, C) float32."""
    assert x.shape[0] == 1, "torch workaround (cat with empty(1,1,C)) requires B == 1"
    T, C = int(x.shape[1]), int(x.shape[2])
    assert C == N_STATE
    x2d = x[0]

    if row_tile is None:
        row_tile = _default_row_tile()
    tq = min(_round_up(int(row_tile), _TILE_QUANTUM), _round_up(T, _TILE_QUANTUM))
    t_pad = _round_up(T, tq)                      # pad T (e.g. 1500) to a tile multiple
    if t_pad != T:
        x2d = jnp.pad(x2d, ((0, t_pad - T), (0, 0)))
    n_tiles = t_pad // tq

    cparams = pltpu.CompilerParams(
        dimension_semantics=("parallel",),        # independent row tiles -> megacore shard
        vmem_limit_bytes=_vmem_limit_bytes())

    # ---- Pass 1: LayerNorm + fused Q|K|V projection, computed once for the sequence ----
    qkv = pl.pallas_call(
        qkv_proj_kernel,
        out_shape=jax.ShapeDtypeStruct((t_pad, 3 * C), MATMUL_DTYPE),
        grid=(n_tiles,),
        in_specs=[pl.BlockSpec((tq, C), lambda i: (i, 0)),
                  _pinned(fp["aln_g"]), _pinned(fp["aln_b"]),
                  _pinned(fp["wqkv"]), _pinned(fp["bqkv"])],
        out_specs=pl.BlockSpec((tq, 3 * C), lambda i: (i, 0)),
        compiler_params=cparams,
    )(x2d, fp["aln_g"], fp["aln_b"], fp["wqkv"], fp["bqkv"])

    # Head split / transpose done once in plain XLA (cheap vs. per-tile recompute).
    q3 = qkv[:, :C].reshape(t_pad, N_HEAD, DPH).transpose(1, 0, 2)    # (H, Tp, DPH)
    k3 = qkv[:, C:2 * C].reshape(t_pad, N_HEAD, DPH).transpose(1, 0, 2)
    v3 = qkv[:, 2 * C:].reshape(t_pad, N_HEAD, DPH).transpose(1, 0, 2)

    # ---- Pass 2: attention + out-projection + MLP over query-row tiles ----
    out = pl.pallas_call(
        _make_block_kernel(T, t_pad),
        out_shape=jax.ShapeDtypeStruct((t_pad, C), jnp.float32),
        grid=(n_tiles,),
        in_specs=[pl.BlockSpec((tq, C), lambda i: (i, 0)),              # x row tile (residual)
                  pl.BlockSpec((N_HEAD, tq, DPH), lambda i: (0, i, 0)),  # q row tile (head-major)
                  _pinned(k3), _pinned(v3),
                  _pinned(fp["wo3"]), _pinned(fp["bo"]),
                  _pinned(fp["mln_g"]), _pinned(fp["mln_b"]),
                  _pinned(fp["w1"]), _pinned(fp["b1"]),
                  _pinned(fp["w2"]), _pinned(fp["b2"])],
        out_specs=pl.BlockSpec((tq, C), lambda i: (i, 0)),
        compiler_params=cparams,
    )(x2d, q3, k3, v3, fp["wo3"], fp["bo"], fp["mln_g"], fp["mln_b"],
      fp["w1"], fp["b1"], fp["w2"], fp["b2"])

    return out[:T][None]


# ------------------------------------ reference ---------------------------------------
def reference(x, p):
    """Pure-JAX f32 mirror of the torch forward (workaround == identity), unfused params."""
    def ln(t, g, b):
        mu = t.mean(-1, keepdims=True)
        var = ((t - mu) ** 2).mean(-1, keepdims=True)
        return (t - mu) / jnp.sqrt(var + LN_EPS) * g + b

    def attn(t):
        q = t @ p["wq"] + p["bq"]
        k = (t @ p["wk"]) * QK_SCALE
        v = t @ p["wv"] + p["bv"]
        outs = []
        for h in range(N_HEAD):
            sl = slice(h * DPH, (h + 1) * DPH)
            s = q[:, :, sl] @ jnp.swapaxes(k[:, :, sl], 1, 2)
            w = jax.nn.softmax(s, axis=-1)
            outs.append(w @ v[:, :, sl])
        wv = jnp.concatenate(outs, axis=-1)
        return wv @ p["wo"] + p["bo"]

    x = x + attn(ln(x, p["attn_ln_g"], p["attn_ln_b"]))
    h = ln(x, p["mlp_ln_g"], p["mlp_ln_b"]) @ p["w1"] + p["b1"]
    h = 0.5 * h * (1.0 + jax.lax.erf(h * _INV_SQRT2))
    return x + h @ p["w2"] + p["b2"]


def make_params(key):
    ks = jax.random.split(key, 16)
    n = lambda k, shp, s=0.05: (s * jax.random.normal(k, shp)).astype(jnp.float32)
    return {
        "attn_ln_g": jnp.ones((1, N_STATE), jnp.float32),
        "attn_ln_b": jnp.zeros((1, N_STATE), jnp.float32),
        "wq": n(ks[0], (N_STATE, N_STATE)), "bq": n(ks[1], (1, N_STATE)),
        "wk": n(ks[2], (N_STATE, N_STATE)),                      # key has no bias
        "wv": n(ks[3], (N_STATE, N_STATE)), "bv": n(ks[4], (1, N_STATE)),
        "wo": n(ks[5], (N_STATE, N_STATE)), "bo": n(ks[6], (1, N_STATE)),
        "mlp_ln_g": jnp.ones((1, N_STATE), jnp.float32),
        "mlp_ln_b": jnp.zeros((1, N_STATE), jnp.float32),
        "w1": n(ks[7], (N_STATE, N_MLP)), "b1": n(ks[8], (1, N_MLP)),
        "w2": n(ks[9], (N_MLP, N_STATE)), "b2": n(ks[10], (1, N_STATE)),
    }


if __name__ == "__main__":
    key = jax.random.PRNGKey(0)
    pkey, xkey = jax.random.split(key)
    params = make_params(pkey)
    fused = fuse_params(params)          # one-time, host/XLA side (param-load time)

    # bf16 MXU operands + approx softmax reciprocal -> compare against the f32 reference
    # with a bf16-appropriate tolerance.
    RTOL = ATOL = 1e-2

    # Case 1: T not a multiple of the tile -> exercises padding + key mask + 2-step grid.
    x1 = jax.random.normal(xkey, (1, 20, N_STATE), jnp.float32)
    y1 = residual_attention_block(x1, fused, row_tile=16)
    jax.block_until_ready(y1)
    assert y1.shape == x1.shape
    assert np.allclose(np.asarray(y1), np.asarray(reference(x1, params)),
                       rtol=RTOL, atol=ATOL), "mismatch vs JAX reference (padded case)"

    # Case 2: default (large) row tile -> single grid step, no padding.
    x2 = jax.random.normal(jax.random.fold_in(xkey, 1), (1, 16, N_STATE), jnp.float32)
    y2 = residual_attention_block(x2, fused)
    jax.block_until_ready(y2)
    assert y2.shape == x2.shape
    assert np.allclose(np.asarray(y2), np.asarray(reference(x2, params)),
                       rtol=RTOL, atol=ATOL), "mismatch vs JAX reference (default case)"

    print("KERNEL_OK")
</pallas_src>

<mosaic_0001>
module attributes {stable_mosaic.version = 11 : i64} {
  func.func @qkv_proj_kernel(%arg0: i32, %arg1: memref<16x32xf32, #tpu.memory_space<vmem>>, %arg2: memref<1x32xf32, #tpu.memory_space<vmem>>, %arg3: memref<1x32xf32, #tpu.memory_space<vmem>>, %arg4: memref<32x96xbf16, #tpu.memory_space<vmem>>, %arg5: memref<1x96xf32, #tpu.memory_space<vmem>>, %arg6: memref<16x96xbf16, #tpu.memory_space<vmem>>) attributes {dimension_semantics = [#tpu.dimension_semantics<parallel>], iteration_bounds = array<i64: 2>, scalar_prefetch = 0 : i64, scratch_operands = 0 : i64, tpu.core_type = #tpu.core_type<tc>, window_params = [{transform_indices = @transform_0, window_bounds = array<i64: 16, 32>}, {pipeline_mode = #tpu.pipeline_mode<synchronous>, transform_indices = @transform_1, window_bounds = array<i64: 1, 32>}, {pipeline_mode = #tpu.pipeline_mode<synchronous>, transform_indices = @transform_2, window_bounds = array<i64: 1, 32>}, {pipeline_mode = #tpu.pipeline_mode<synchronous>, transform_indices = @transform_3, window_bounds = array<i64: 32, 96>}, {pipeline_mode = #tpu.pipeline_mode<synchronous>, transform_indices = @transform_4, window_bounds = array<i64: 1, 96>}, {transform_indices = @transform_5, window_bounds = array<i64: 16, 96>}]} {
    %c0 = arith.constant 0 : index
    %c0_0 = arith.constant 0 : index
    %0 = vector.load %arg1[%c0, %c0_0] : memref<16x32xf32, #tpu.memory_space<vmem>>, vector<16x32xf32>
    %c0_1 = arith.constant 0 : index
    %c0_2 = arith.constant 0 : index
    %1 = vector.load %arg2[%c0_1, %c0_2] : memref<1x32xf32, #tpu.memory_space<vmem>>, vector<1x32xf32>
    %c0_3 = arith.constant 0 : index
    %c0_4 = arith.constant 0 : index
    %2 = vector.load %arg3[%c0_3, %c0_4] : memref<1x32xf32, #tpu.memory_space<vmem>>, vector<1x32xf32>
    %cst = arith.constant dense<0.000000e+00> : vector<16xf32>
    %3 = vector.multi_reduction <add>, %0, %cst [1] : vector<16x32xf32> to vector<16xf32>
    %4 = vector.shape_cast %3 : vector<16xf32> to vector<16x1xf32>
    %cst_5 = arith.constant 3.200000e+01 : f32
    %5 = vector.broadcast %cst_5 : f32 to vector<16x1xf32>
    %6 = arith.divf %4, %5 : vector<16x1xf32>
    %7 = vector.broadcast %6 : vector<16x1xf32> to vector<16x32xf32>
    %8 = arith.subf %0, %7 : vector<16x32xf32>
    %9 = arith.mulf %8, %8 : vector<16x32xf32>
    %cst_6 = arith.constant dense<0.000000e+00> : vector<16xf32>
    %10 = vector.multi_reduction <add>, %9, %cst_6 [1] : vector<16x32xf32> to vector<16xf32>
    %11 = vector.shape_cast %10 : vector<16xf32> to vector<16x1xf32>
    %cst_7 = arith.constant 3.200000e+01 : f32
    %12 = vector.broadcast %cst_7 : f32 to vector<16x1xf32>
    %13 = arith.divf %11, %12 : vector<16x1xf32>
    %14 = vector.broadcast %6 : vector<16x1xf32> to vector<16x32xf32>
    %15 = arith.subf %0, %14 : vector<16x32xf32>
    %cst_8 = arith.constant 1.000000e-07 : f32
    %16 = vector.broadcast %cst_8 : f32 to vector<16x1xf32>
    %17 = arith.addf %13, %16 : vector<16x1xf32>
    %18 = math.rsqrt %17 : vector<16x1xf32>
    %19 = vector.broadcast %18 : vector<16x1xf32> to vector<16x32xf32>
    %20 = arith.mulf %15, %19 : vector<16x32xf32>
    %21 = vector.broadcast %1 : vector<1x32xf32> to vector<16x32xf32>
    %22 = arith.mulf %20, %21 : vector<16x32xf32>
    %23 = vector.broadcast %2 : vector<1x32xf32> to vector<16x32xf32>
    %24 = arith.addf %22, %23 : vector<16x32xf32>
    %25 = arith.truncf %24 : vector<16x32xf32> to vector<16x32xbf16>
    %c0_9 = arith.constant 0 : index
    %c0_10 = arith.constant 0 : index
    %26 = vector.load %arg4[%c0_9, %c0_10] : memref<32x96xbf16, #tpu.memory_space<vmem>>, vector<32x96xbf16>
    %cst_11 = arith.constant dense<0.000000e+00> : vector<16x96xf32>
    %27 = tpu.matmul %25, %26, %cst_11 {dimension_numbers = #tpu.dot_dimension_numbers<[1], [0], [0], [1], [0, 0, 1, 1], [], []>} : vector<16x32xbf16>, vector<32x96xbf16>, vector<16x96xf32> -> vector<16x96xf32>
    %c0_12 = arith.constant 0 : index
    %c0_13 = arith.constant 0 : index
    %28 = vector.load %arg5[%c0_12, %c0_13] : memref<1x96xf32, #tpu.memory_space<vmem>>, vector<1x96xf32>
    %29 = vector.broadcast %28 : vector<1x96xf32> to vector<16x96xf32>
    %30 = arith.addf %27, %29 : vector<16x96xf32>
    %31 = arith.truncf %30 : vector<16x96xf32> to vector<16x96xbf16>
    %c0_14 = arith.constant 0 : index
    %c0_15 = arith.constant 0 : index
    %32 = vector.load %arg6[%c0_14, %c0_15] : memref<16x96xbf16, #tpu.memory_space<vmem>>, vector<16x96xbf16>
    tpu.vector_store %arg6[%c0_14, %c0_15], %31 {strides = array<i32>} : memref<16x96xbf16, #tpu.memory_space<vmem>>, vector<16x96xbf16>,
    return
  }
  func.func @transform_0(%arg0: i32) -> (i32, i32) {
    %c0_i32 = arith.constant 0 : i32
    %c0_i32_0 = arith.constant 0 : i32
    return %arg0, %c0_i32 : i32, i32
  }
  func.func @transform_1(%arg0: i32) -> (i32, i32) {
    %c0_i32 = arith.constant 0 : i32
    %c0_i32_0 = arith.constant 0 : i32
    %c0_i32_1 = arith.constant 0 : i32
    return %c0_i32, %c0_i32_0 : i32, i32
  }
  func.func @transform_2(%arg0: i32) -> (i32, i32) {
    %c0_i32 = arith.constant 0 : i32
    %c0_i32_0 = arith.constant 0 : i32
    %c0_i32_1 = arith.constant 0 : i32
    return %c0_i32, %c0_i32_0 : i32, i32
  }
  func.func @transform_3(%arg0: i32) -> (i32, i32) {
    %c0_i32 = arith.constant 0 : i32
    %c0_i32_0 = arith.constant 0 : i32
    %c0_i32_1 = arith.constant 0 : i32
    return %c0_i32, %c0_i32_0 : i32, i32
  }
  func.func @transform_4(%arg0: i32) -> (i32, i32) {
    %c0_i32 = arith.constant 0 : i32
    %c0_i32_0 = arith.constant 0 : i32
    %c0_i32_1 = arith.constant 0 : i32
    return %c0_i32, %c0_i32_0 : i32, i32
  }
  func.func @transform_5(%arg0: i32) -> (i32, i32) {
    %c0_i32 = arith.constant 0 : i32
    %c0_i32_0 = arith.constant 0 : i32
    return %arg0, %c0_i32 : i32, i32
  }
}

</mosaic_0001>

<bundles_post_ra>
// kernel: tpu_custom_call.1
= control target key start
LH: loop header
LB: loop body
LE: loop exit
PB: predicated region body
PF: predicated region fallthrough
CT: control target
= control target key end

     0   :  { %s968_s0 = inlined_call_operand.hbm [shape: f32[32,32], index: 0, kind: input, shape index: {}]   ;;  %s969_s1 = inlined_call_operand.hbm [shape: f32[1,32], index: 1, kind: input, shape index: {}]   ;;  %s970_s2 = inlined_call_operand.vmem [shape: f32[1,32], index: 2, kind: input, shape index: {}]   ;;  %s971_s3 = inlined_call_operand.hbm [shape: bf16[32,96], index: 3, kind: input, shape index: {}]   ;;  %s972_s4 = inlined_call_operand.vmem [shape: f32[1,96], index: 4, kind: input, shape index: {}]   ;;  %s973_s5 = inlined_call_operand.hbm [shape: bf16[32,96], index: 5, kind: output, shape index: {}]  }
   0x1   :  { %974 = sst [smem:[#allocation13_spill]] %s969_s1 }
   0x2   :  { %975 = sst [smem:[#allocation14_spill]] %s971_s3 }
   0x3   :  { %10 = vsyncpa [#allocation3], 0 }
   0x4   :  { %12 = vsyncpa [#allocation3 + $0x1], 0 }
   0x5   :  { %13 = vsyncpa [#allocation6], 0 }
   0x6   :  { %14 = vsyncpa [#allocation4], 0 }
   0x7   :  { %16 = vsyncpa [#allocation4 + $0x1], 0  ;;  %s811_s18 = smov 0   ;;  %s813_s19 = smov 0  }
   0x8   :  { %s815_s20 = smov 0   ;;  %s817_s21 = smov 0  }
   0x9 LB: > { %s832_s22 = sadd.s32 4294967295, %s770_s21   ;;  %s496_s23 = sadd.s32 4294967294, %s770_s21   ;;  %s770_s21 = sphi %s817_s21, %s990_s21   ;;  %s766_s20 = sphi %s815_s20, %s989_s20   ;;  %s762_s19 = sphi %s813_s19, %s988_s19   ;;  %s758_s18 = sphi %s811_s18, %s987_s18  }
   0xa   : > { %s836_s24 = sadd.s32 1, %s770_s21   ;;  %s29_s25 = sadd.s32 1, %s766_s20 }
   0xb   : > { %s26_s26 = ssub.s32 %s770_s21, %s836_s24  ;;  %p36_p0 = scmp.ne.s32.totalorder %s766_s20, %s762_s19 }
   0xc   : > { %p27_p1 = scmp.eq.s32.totalorder %s26_s26, 0  ;;  %p37_p2 = scmp.eq.s32.totalorder %s770_s21, 0 }
   0xd   : > { %p42_p3 = scmp.ne.s32.totalorder %s762_s19, %s758_s18  ;;  %p43_p4 = scmp.eq.s32.totalorder %s832_s22, 0 }
   0xe   : > { %s848_s27 = scalar_select %p27_p1, %s766_s20, %s29_s25  }
   0xf   : > { %p850_p5 = por %p37_p2, %p36_p0  ;;  %p856_p6 = por %p43_p4, %p42_p3 }
  0x10   : > { %976 = sst [smem:[#allocation12_spill]] %s848_s27  ;;  %p150_p7 = scmp.eq.s32.totalorder %s832_s22, 1 }
  0x11   : > { %p156_p8 = scmp.eq.s32.totalorder %s496_s23, 1  ;;  %p497_p9 = scmp.ge.s32.totalorder %s770_s21, 1 }
  0x12   : > { %p163_p10 = scmp.lt.s32.totalorder %s770_s21, 3  ;;  %p863_p11 = por %p150_p7, %p36_p0 }
  0x13   : > { %p867_p12 = por %p156_p8, %p42_p3  ;;  %s982_s1 = sld [smem:[#allocation13_spill]] }
  0x14   : > { %p871_p13 = pnand %p497_p9, %p163_p10  ;;  %s772_s11 = smov [#allocation5]  }
  0x15   : > { %s177_s12 = sshll.u32 %s772_s11, 4  ;;  %p556_p3 = scmp.lt.s32.totalorder %s770_s21, 2  ;;  %s178_s12 = int_to_ptr.vmem [resolvable:$true] %s177_s12 }
  0x16   : > { %p539_p1 = pneg %p871_p13  ;;  %s983_s3 = sld [smem:[#allocation14_spill]] }
  0x17   : > { %p889_p7 = pnand %p556_p3, %p850_p5  ;;  %s773_s17 = smov [#allocation7]  }
  0x18   : > { %p540_p2 = pnand %p539_p1, %p43_p4  ;;  %s191_s23 = sshll.u32 %s773_s17, 4  ;;  %s192_s23 = int_to_ptr.vmem [resolvable:$true] %s191_s23 }
  0x19   : > { %s175_s10 = sshll.u32 %s982_s1, 4  ;;  %s208_s25 = sand.u32 1, %s766_s20   ;;  %s176_s10 = int_to_ptr.hbm [resolvable:$true] %s175_s10 }
  0x1a   : > { %542 = dma.hbm_to_vmem [thread:$0]  (!%p540_p2), %s176_s10, 16, %s178_s12, [#allocation6]  }
  0x1b   : > { %s774_s26 = smov 64   ;;  %s775_s8 = smov 4  }
  0x1c   : > { %s189_s15 = sshll.u32 %s983_s3, 4  ;;  %s501_s9 = sshll.u32 %s208_s25, 4  ;;  %s190_s15 = int_to_ptr.hbm [resolvable:$true] %s189_s15 }
  0x1d   : > { %545 = dma.hbm_to_vmem [thread:$0]  (!%p540_p2), %s190_s15, 256, %s192_s23, [#allocation6], %s774_s26, %s774_s26, %s775_s8  }
  0x1e   : > { %s523_s11 = sshll.u32 %s770_s21, 4  ;;  %s212_s10 = scalar_lea.vmem [#allocation2], %s501_s9 }
  0x1f   : > { %s217_s14 = scalar_lea.hbm %s968_s0, %s523_s11  ;;  %s220_s28 = sshll.u32 %s212_s10, 4  ;;  %s221_s28 = int_to_ptr.vmem [resolvable:$true] %s220_s28 }
  0x20   : > { %s218_s12 = sshll.u32 %s217_s14, 4  ;;  %s209_s3 = scalar_lea.sflag [#allocation3], %s208_s25  ;;  %s219_s12 = int_to_ptr.hbm [resolvable:$true] %s218_s12 }
  0x21   : > { %s670_s27 = sshra.s32 %s219_s12, 4  ;;  %p674_p8 = pneg %p889_p7  ;;  %s671_s27 = int_to_ptr.hbm [resolvable:$true] %s670_s27 }
  0x22   : > { %s672_s17 = scalar_lea.hbm %s671_s27, 16  ;;  %s677_s26 = scalar_lea.hbm %s968_s0, 32 }
  0x23   : > { %p673_p5 = scmp.ne.s32.totalorder %s671_s27, %s672_s17  ;;  %p678_p1 = scmp.lt.s32.totalorder %s671_s27, %s968_s0 }
  0x24   : > { %p679_p2 = scmp.lt.s32.totalorder %s677_s26, %s672_s17 }
  0x25   : > { %p675_p9 = pnand %p674_p8, %p673_p5 }
  0x26   : > { %p680_p3 = por %p679_p2, %p678_p1 }
  0x27   : > { %p676_p10 = pneg %p675_p9 }
  0x29   : > { %p681_p0 = pnand %p680_p3, %p676_p10 }
  0x2b   : > { %684 = shalt.err (!%p681_p0)
}
  0x2c   : > { %s776_s25 = smov 128   ;;  %s777_s9 = smov 8  }
  0x2d   : > { %549 = dma.hbm_to_vmem [thread:$0]  (!%p889_p7), %s219_s12, 256, %s221_s28, %s209_s3, %s776_s25, %s776_s25, %s777_s9  }
  0x2e   : > { %232 = sbr.rel (%p871_p13) target bundleno = 475 (0x1db), region = 40  ;;  %s911_s11 = sand.u32 (!%p871_p13), 1, %s762_s19  }
  0x2f   : > { %s505_s13 = sshll.u32 (!%p871_p13), %s911_s11, 4  ;;  %s235_s27 = scalar_lea.sflag (!%p871_p13), [#allocation3], %s911_s11 }
  0x30   : > { %s238_s14 = scalar_lea.vmem (!%p871_p13), [#allocation2], %s505_s13 }
  0x33   : > { %745 = dma.done.wait (%p856_p6), %s235_s27, 256  }
  0x34   : > { %747 = vsyncadd (%p856_p6), %s235_s27, 4294967040 }
  0x35   : > { %749 = dma.done.wait (%p43_p4), [#allocation6], 272  }
  0x36   : > { %751 = vsyncadd (%p43_p4), [#allocation6], 4294967024  ;;  %vm283_vm0 = vcmask 261120   ;;  %v279_v0 = vld [vmem:[%s238_s14] sm:$0xff]  ;;  %v280_v2 = vld [vmem:[%s238_s14 + $0x8] sm:$0xff]  ;;  %v778_v4 = vmov 32.0  }
  0x37   : > { %v284_v1 = vsel %vm283_vm0, %v279_v0, 0.0  ;;  %v287_v3 = vsel %vm283_vm0, %v280_v2, 0.0  ;;  %604 = vrcp.f32 %v778_v4  ;;  %v525_v21 = vld [vmem:[#allocation7 + $0x8] sm:$0xff]  ;;  %v524_v23 = vld [vmem:[#allocation7] sm:$0xff]  ;;  %v601_v42 = vld [vmem:[#allocation5] ss:$0 sm:$0xff] }
  0x38   : > { %285 = vadd.xlane.f32.xlu0 %v284_v1  ;;  %375 = vmatpush.bf16.msra.mxu0 %v525_v21  ;;  %v602_v47 = vld [vmem:[%s970_s2] ss:$0 sm:$0xff]  ;;  %s508_s10 = sshll.u32 %s911_s11, 3  ;;  %s526_s28 = sshll.u32 %s832_s22, 3  ;;  %vm385_vm8 = vcmask 781312  }
  0x39   : > { %v603_v52 = vld [vmem:[%s972_s4] ss:$0 sm:$0xff]  ;;  %s400_s15 = scalar_lea.hbm %s973_s5, %s526_s28  ;;  %s275_s23 = scalar_lea.vmem [#allocation8], %s508_s10 }
  0x3a   : > { %s401_s26 = sshll.u32 %s275_s23, 4  ;;  %s403_s1 = sshll.u32 %s400_s15, 4  ;;  %s402_s26 = int_to_ptr.vmem [resolvable:$true] %s401_s26  ;;  %s404_s1 = int_to_ptr.hbm [resolvable:$true] %s403_s1 }
  0x3b   : > { %s389_s8 = scalar_lea.sflag [#allocation4], %s911_s11  ;;  %s714_s25 = sshra.s32 %s404_s1, 4  ;;  %s715_s25 = int_to_ptr.hbm [resolvable:$true] %s714_s25 }
  0x3c   : > { %376 = vmatpush.bf16.msra.mxu0 %v524_v23  ;;  %s716_s22 = scalar_lea.hbm %s715_s25, 8  ;;  %s720_s27 = scalar_lea.hbm %s973_s5, 16 }
  0x3d   : > { %v605_v5 = vpop.eup %604  ;;  %p717_p4 = scmp.ne.s32.totalorder %s715_s25, %s716_s22  ;;  %p721_p0 = scmp.lt.s32.totalorder %s715_s25, %s973_s5 }
  0x3e   : > { %v291_v6 = vmul.f32 32.0, %v605_v5  ;;  %vm295_vm1 = vweird.f32 %v605_v5  ;;  %p722_p7 = scmp.lt.s32.totalorder %s720_s27, %s716_s22 }
  0x3f   : > { %p718_p6 = pnand %p717_p4, %p863_p11 }
  0x40   : > { %288 = vadd.xlane.f32.xlu0 %v287_v3  ;;  %v292_v7 = vsub.f32 1.0, %v291_v6  ;;  %p723_p5 = por %p722_p7, %p721_p0 }
  0x41   : > { %p719_p13 = pneg %p718_p6 }
  0x42   : > { %v293_v8 = vmul.f32 %v605_v5, %v292_v7 }
  0x43   : > { %p724_p8 = pnand %p723_p5, %p719_p13 }
  0x44   : > { %v294_v9 = vadd.f32 %v605_v5, %v293_v8 }
  0x46   : > { %v296_v10 = vsel %vm295_vm1, %v605_v5, %v294_v9 }
  0xab   : > { %v286_v11 = vpop.xlane.xlu0 %285 }
  0xac   : > { %v297_v12 = vmul.f32 %v296_v10, %v286_v11 }
  0xae   : > { %v299_v13 = vsub.f32 %v279_v0, %v297_v12 }
  0xb0   : > { %v301_v14 = vmul.f32 %v299_v13, %v299_v13 }
  0xb2   : > { %v303_v15 = vsel %vm283_vm0, %v301_v14, 0.0 }
  0xb3   : > { %304 = vadd.xlane.f32.xlu1 %v303_v15  ;;  %v289_v16 = vpop.xlane.xlu0 %288 }
  0xb4   : > { %v298_v17 = vmul.f32 %v296_v10, %v289_v16 }
  0xb6   : > { %v300_v18 = vsub.f32 %v280_v2, %v298_v17 }
  0xb8   : > { %v302_v19 = vmul.f32 %v300_v18, %v300_v18 }
  0xba   : > { %v306_v20 = vsel %vm283_vm0, %v302_v19, 0.0 }
  0xbb   : > { %307 = vadd.xlane.f32.xlu1 %v306_v20 }
 0x126   : > { %v305_v22 = vpop.xlane.xlu1 %304 }
 0x127   : > { %v309_v24 = vmul.f32 %v305_v22, %v296_v10 }
 0x129   : > { %v311_v25 = vadd.f32 1e-07, %v309_v24 }
 0x12b   : > { %606 = vrsqrt.f32 %v311_v25  ;;  %vm319_vm3 = vweird.f32 %v311_v25 }
 0x12e   : > { %v308_v26 = vpop.xlane.xlu1 %307 }
 0x12f   : > { %v310_v27 = vmul.f32 %v308_v26, %v296_v10 }
 0x131   : > { %v607_v28 = vpop.eup %606  ;;  %v312_v29 = vadd.f32 1e-07, %v310_v27 }
 0x132   : > { %v314_v30 = vmul.f32 %v607_v28, %v311_v25  ;;  %vm320_vm2 = vweird.f32 %v607_v28 }
 0x133   : > { %608 = vrsqrt.f32 %v312_v29  ;;  %vm321_vm4 = vmor %vm319_vm3, %vm320_vm2  ;;  %vm329_vm6 = vweird.f32 %v312_v29 }
 0x134   : > { %v315_v31 = vmul.f32 %v607_v28, %v314_v30 }
 0x136   : > { %v316_v32 = vmul.f32 0.5, %v315_v31 }
 0x138   : > { %v317_v33 = vsub.f32 1.5, %v316_v32 }
 0x139   : > { %v609_v34 = vpop.eup %608 }
 0x13a   : > { %v318_v35 = vmul.f32 %v607_v28, %v317_v33  ;;  %v324_v36 = vmul.f32 %v609_v34, %v312_v29  ;;  %vm330_vm5 = vweird.f32 %v609_v34 }
 0x13b   : > { %vm331_vm7 = vmor %vm329_vm6, %vm330_vm5 }
 0x13c   : > { %v325_v37 = vmul.f32 %v609_v34, %v324_v36  ;;  %v322_v38 = vsel %vm321_vm4, %v607_v28, %v318_v35 }
 0x13d   : > { %v333_v41 = vmul.f32 %v322_v38, %v299_v13 }
 0x13e   : > { %v326_v39 = vmul.f32 0.5, %v325_v37 }
 0x13f   : > { %v338_v46 = vmul.f32 %v601_v42, %v333_v41 }
 0x140   : > { %v327_v40 = vsub.f32 1.5, %v326_v39 }
 0x141   : > { %v343_v49 = vadd.f32 %v602_v47, %v338_v46 }
 0x142   : > { %v328_v43 = vmul.f32 %v609_v34, %v327_v40 }
 0x144   : > { %v332_v44 = vsel %vm331_vm7, %v609_v34, %v328_v43 }
 0x145   : > { %v334_v45 = vmul.f32 %v332_v44, %v300_v18 }
 0x147   : > { %v339_v48 = vmul.f32 %v601_v42, %v334_v45 }
 0x149   : > { %v344_v50 = vadd.f32 %v602_v47, %v339_v48 }
 0x14b   : > { %v345_v51 = vpack.c.bf16 %v344_v50, %v343_v49 }
 0x14d   : > { %517 = vmatmul.msk.bf16.vlgmr.msra.gmra.mxu0 %vm283_vm0, %v345_v51 }
 0x1ca   : > { %v378_v53 = vpop.f32.mrf.mxu0 }
 0x1cb   : > { %v379_v54 = vadd.f32 %v603_v52, %v378_v53 }
 0x1cd   : > { %v383_v55 = vpack.c.bf16 %v379_v54, %v379_v54 }
 0x1cf   : > { %386 = vst.msk [vmem:[%s275_s23] sm:$0xf] %vm385_vm8, %v383_v55 }
 0x1d2   : > { %v380_v56 = vpop.f32.mrf.mxu0 }
 0x1d3   : > { %v381_v57 = vadd.f32 %v603_v52, %v380_v56 }
 0x1d5   : > { %v384_v58 = vpack.c.bf16 %v381_v57, %v381_v57 }
 0x1d7   : > { %387 = vst.msk [vmem:[%s275_s23 + $0x4] sm:$0xf] %vm385_vm8, %v384_v58 }
 0x1d8   : > { %727 = shalt.err (!%p724_p8)
}
 0x1d9   : > { %s779_s11 = smov 64   ;;  %s780_s29 = smov 4  }
 0x1da   : > { %537 = dma.vmem_to_hbm [thread:$0]  (%p863_p11), %s402_s26, 128, %s404_s1, %s389_s8, %s779_s11, %s779_s11, %s780_s29  }
 0x1db PF: > { %s418_s7 = sand.u32 1, %s758_s18   ;;  %p985_p9 = scmp.ge.s32.totalorder %s770_s21, 2 }
 0x1dc   : > { %s419_s16 = scalar_lea.sflag [#allocation4], %s418_s7 }
 0x1dd   : > { %p551_p10 = pnand %p985_p9, %p867_p12 }
 0x1df   : > { %p552_p1 = pneg %p551_p10 }
 0x1e1   : > { %753 = dma.done.wait (%p552_p1), %s419_s16, 128  }
 0x1e2   : > { %755 = vsyncadd (%p552_p1), %s419_s16, 4294967168  ;;  %s986_s10 = sld [smem:[#allocation12_spill]]  ;;  %p19_p2 = scmp.ge.s32.totalorder %s836_s24, 4  }
 0x1e3   : > { %s987_s18 = smov %s762_s19  ;;  %s988_s19 = smov %s766_s20 }
 0x1e4   : > { %s990_s21 = smov %s836_s24  ;;  %21 = sbr.rel (!%p19_p2) target bundleno = 9 (0x9), region = 93 }
 0x1e8   : > { %s989_s20 = smov %s986_s10 }
 0x1e9   :  { %425 = vsyncpa [#allocation3], 1 }
 0x1ea   :  { %427 = vsyncpa [#allocation3 + $0x1], 1 }
 0x1eb   :  { %428 = vsyncpa [#allocation6], 1 }
 0x1ec   :  { %429 = vsyncpa [#allocation4], 1 }
 0x1ed   :  { %431 = vsyncpa [#allocation4 + $0x1], 1 }

</bundles_post_ra>
